<compile_context>
chip_gen: v5e
topology: v5e:2x2
jax: 0.10.0
libtpu: 0.0.40
codegen_flags: <defaults>
</compile_context>

<pallas_src>
import functools
import math

import numpy as np

import jax
import jax.numpy as jnp
from jax.experimental import pallas as pl
from jax.experimental.pallas import tpu as pltpu


# --------------------------------------------------------------------------- #
# Helpers (trace-time / host-side)
# --------------------------------------------------------------------------- #
def _adaptive_bin_edges(in_size: int, out_size: int):
    """Bin boundaries used by PyTorch AdaptiveMax/AvgPool2d."""
    edges = []
    for i in range(out_size):
        start = (i * in_size) // out_size
        end = -((-(i + 1) * in_size) // out_size)  # ceil((i+1)*in/out)
        edges.append((start, end))
    return edges


def _choose_c_tile(C: int, H: int, W: int, itemsize: int,
                   budget_bytes: int = 8 << 20) -> int:
    """Largest multiple-of-128 divisor of C whose (1,H,W,C_TILE) block fits the
    per-buffer VMEM budget; whole C if it is not lane-tileable."""
    if C % 128 != 0:
        return C
    per_channel = max(H * W * itemsize, 1)
    cap = max(128, budget_bytes // per_channel)
    best = None
    cand = 128
    while cand <= C:
        if C % cand == 0 and cand <= cap:
            best = cand
        cand += 128
    return best if best is not None else C


def _make_avg_binning_matrix(H: int, W: int, sides):
    """(total_bins, H*W) f32 matrix: entry = 1/bin_area if pixel is in bin."""
    total = sum(s * s for s in sides)
    P = np.zeros((total, H * W), dtype=np.float32)
    row = 0
    for s in sides:
        for (h0, h1) in _adaptive_bin_edges(H, s):
            for (w0, w1) in _adaptive_bin_edges(W, s):
                area = (h1 - h0) * (w1 - w0)
                mask = np.zeros((H, W), dtype=np.float32)
                mask[h0:h1, w0:w1] = 1.0 / float(area)
                P[row] = mask.reshape(-1)
                row += 1
    return jnp.asarray(P)


# --------------------------------------------------------------------------- #
# Kernels
# --------------------------------------------------------------------------- #
def _spp_max_kernel(x_ref, o_ref, *, sides, level_offsets, hierarchical):
    # x_ref: (1, H, W, C_TILE) channels-last;  o_ref: (1, total_bins, C_TILE).
    _, H, W, _ = x_ref.shape
    out_dtype = o_ref.dtype

    def bin_max(h0, h1, w0, w1):
        blk = x_ref[0, h0:h1, w0:w1, :].astype(jnp.float32)   # (h, w, C)
        return jnp.max(blk, axis=(0, 1))[None, :]              # (1, C) lane-dense

    def store(row, val):
        o_ref[0, row:row + 1, :] = val.astype(out_dtype)

    if hierarchical:
        # Finest level reduces the image exactly once; coarser levels are
        # maxes of already-pooled rows (valid because bin edges nest).
        fine_idx = max(range(len(sides)), key=lambda i: sides[i])
        fine_side = sides[fine_idx]
        fine_off = level_offsets[fine_idx]
        h_edges = _adaptive_bin_edges(H, fine_side)
        w_edges = _adaptive_bin_edges(W, fine_side)
        for i, (h0, h1) in enumerate(h_edges):
            for j, (w0, w1) in enumerate(w_edges):
                store(fine_off + i * fine_side + j, bin_max(h0, h1, w0, w1))
        for li, s in enumerate(sides):
            if li == fine_idx:
                continue
            off = level_offsets[li]
            r = fine_side // s
            for i in range(s):
                for j in range(s):
                    acc = None
                    for a in range(r):
                        for b in range(r):
                            row = fine_off + (i * r + a) * fine_side + (j * r + b)
                            v = o_ref[0, row:row + 1, :].astype(jnp.float32)
                            acc = v if acc is None else jnp.maximum(acc, v)
                    store(off + i * s + j, acc)
    else:
        # General adaptive-pool edges (possibly overlapping, non-nesting).
        for li, s in enumerate(sides):
            off = level_offsets[li]
            h_edges = _adaptive_bin_edges(H, s)
            w_edges = _adaptive_bin_edges(W, s)
            for i, (h0, h1) in enumerate(h_edges):
                for j, (w0, w1) in enumerate(w_edges):
                    store(off + i * s + j, bin_max(h0, h1, w0, w1))


def _spp_avg_kernel(x_ref, p_ref, o_ref):
    # x_ref: (1, H*W, C_TILE);  p_ref: (total_bins, H*W) f32;
    # o_ref: (1, total_bins, C_TILE).  Pooling == one MXU matmul.
    x = x_ref[0].astype(jnp.float32)                               # (H*W, C)
    pooled = jnp.dot(p_ref[...], x, preferred_element_type=jnp.float32)
    o_ref[...] = pooled[None, :, :].astype(o_ref.dtype)


# --------------------------------------------------------------------------- #
# Wrapper
# --------------------------------------------------------------------------- #
def spatial_pyramid_pooling(feature_maps, num_pools=(1, 4, 16), mode="max"):
    """Pallas SPP: (N, C, H, W) -> (N, C, sum(num_pools))."""
    assert feature_maps.ndim == 4, "Expected 4D input of (N, C, H, W)"
    if mode not in ("max", "avg"):
        raise NotImplementedError(
            f"Unknown pooling mode '{mode}', expected 'max' or 'avg'")

    num_pools = tuple(int(p) for p in num_pools)
    sides = []
    for p in num_pools:
        s = int(math.isqrt(p))
        if s * s != p:
            raise ValueError(f"Bin size {p} is not a perfect square")
        sides.append(s)
    sides = tuple(sides)

    N, C, H, W = map(int, feature_maps.shape)
    total_bins = int(sum(num_pools))
    level_offsets, off = [], 0
    for p in num_pools:
        level_offsets.append(off)
        off += p
    level_offsets = tuple(level_offsets)

    itemsize = feature_maps.dtype.itemsize
    c_tile = _choose_c_tile(C, H, W, itemsize)
    num_c_tiles = C // c_tile

    # Channels-last so C rides the 128-lane axis inside the kernel.
    x_cl = jnp.transpose(feature_maps, (0, 2, 3, 1))  # (N, H, W, C)

    out_shape = jax.ShapeDtypeStruct((N, total_bins, C), feature_maps.dtype)
    out_spec = pl.BlockSpec((1, total_bins, c_tile), lambda n, c: (n, 0, c))

    if mode == "avg":
        flops = 2 * N * C * H * W * total_bins
    else:
        flops = N * C * H * W * len(num_pools)
    cost = pl.CostEstimate(
        flops=int(flops),
        transcendentals=0,
        bytes_accessed=int(N * C * H * W * itemsize
                           + N * C * total_bins * itemsize),
    )
    cparams = pltpu.CompilerParams(dimension_semantics=("parallel", "parallel"))

    if mode == "avg":
        x_in = x_cl.reshape(N, H * W, C)
        P = _make_avg_binning_matrix(H, W, sides)
        out_nbc = pl.pallas_call(
            _spp_avg_kernel,
            out_shape=out_shape,
            grid=(N, num_c_tiles),
            in_specs=[
                pl.BlockSpec((1, H * W, c_tile), lambda n, c: (n, 0, c)),
                pl.BlockSpec((total_bins, H * W), lambda n, c: (0, 0)),
            ],
            out_specs=out_spec,
            compiler_params=cparams,
            cost_estimate=cost,
        )(x_in, P)
    else:
        max_side = max(sides)
        hierarchical = (H % max_side == 0 and W % max_side == 0
                        and all(max_side % s == 0 for s in sides))
        kernel = functools.partial(
            _spp_max_kernel, sides=sides, level_offsets=level_offsets,
            hierarchical=hierarchical)
        out_nbc = pl.pallas_call(
            kernel,
            out_shape=out_shape,
            grid=(N, num_c_tiles),
            in_specs=[pl.BlockSpec((1, H, W, c_tile), lambda n, c: (n, 0, 0, c))],
            out_specs=out_spec,
            compiler_params=cparams,
            cost_estimate=cost,
        )(x_cl)

    # Back to PyTorch layout (N, C, total_bins).
    return jnp.transpose(out_nbc, (0, 2, 1))


# --------------------------------------------------------------------------- #
# Pure-JAX reference (mirrors PyTorch adaptive-pool semantics)
# --------------------------------------------------------------------------- #
def _spp_reference(feature_maps, num_pools=(1, 4, 16), mode="max"):
    N, C, H, W = feature_maps.shape
    reduce_fn = jnp.max if mode == "max" else jnp.mean
    x = feature_maps.astype(jnp.float32)
    pooled = []
    for p in num_pools:
        side = int(math.isqrt(p))
        for (h0, h1) in _adaptive_bin_edges(H, side):
            for (w0, w1) in _adaptive_bin_edges(W, side):
                pooled.append(reduce_fn(x[:, :, h0:h1, w0:w1], axis=(2, 3)))
    return jnp.stack(pooled, axis=-1).astype(feature_maps.dtype)


if __name__ == "__main__":
    key = jax.random.PRNGKey(0)

    # Small shapes consistent with the module: N=2, C=4, H=W=16.
    x = jax.random.normal(key, (2, 4, 16, 16), dtype=jnp.float32)

    # max mode (hierarchical path: 16 | 4 | 1 nest inside H=W=16)
    out_max = jax.block_until_ready(
        spatial_pyramid_pooling(x, num_pools=(1, 4, 16), mode="max"))
    ref_max = _spp_reference(x, (1, 4, 16), "max")
    assert out_max.shape == (2, 4, 21), out_max.shape
    assert jnp.allclose(out_max, ref_max, atol=1e-5, rtol=1e-5), "max mismatch"

    # avg mode (MXU binning-matrix path)
    out_avg = jax.block_until_ready(
        spatial_pyramid_pooling(x, num_pools=(1, 4, 16), mode="avg"))
    ref_avg = _spp_reference(x, (1, 4, 16), "avg")
    assert jnp.allclose(out_avg, ref_avg, atol=1e-5, rtol=1e-5), "avg mismatch"

    # Non-nesting spatial size exercises the general fallback max path.
    key2, _ = jax.random.split(key)
    x2 = jax.random.normal(key2, (1, 3, 10, 10), dtype=jnp.float32)
    out2 = jax.block_until_ready(
        spatial_pyramid_pooling(x2, num_pools=(1, 4, 16), mode="max"))
    ref2 = _spp_reference(x2, (1, 4, 16), "max")
    assert out2.shape == (1, 3, 21), out2.shape
    assert jnp.allclose(out2, ref2, atol=1e-5, rtol=1e-5), "fallback mismatch"

    print("KERNEL_OK")
</pallas_src>

<mosaic_0001>
module attributes {stable_mosaic.version = 11 : i64} {
  func.func @_spp_max_kernel(%arg0: i32, %arg1: i32, %arg2: memref<1x16x16x4xf32, #tpu.memory_space<vmem>>, %arg3: memref<1x21x4xf32, #tpu.memory_space<vmem>>) attributes {dimension_semantics = [#tpu.dimension_semantics<parallel>, #tpu.dimension_semantics<parallel>], iteration_bounds = array<i64: 2, 1>, scalar_prefetch = 0 : i64, scratch_operands = 0 : i64, tpu.core_type = #tpu.core_type<tc>, window_params = [{transform_indices = @transform_0, window_bounds = array<i64: 1, 16, 16, 4>}, {transform_indices = @transform_1, window_bounds = array<i64: 1, 21, 4>}]} {
    %c0 = arith.constant 0 : index
    %c0_0 = arith.constant 0 : index
    %c0_1 = arith.constant 0 : index
    %c0_2 = arith.constant 0 : index
    %0 = vector.load %arg2[%c0, %c0_0, %c0_1, %c0_2] : memref<1x16x16x4xf32, #tpu.memory_space<vmem>>, vector<1x4x4x4xf32>
    %1 = vector.shape_cast %0 : vector<1x4x4x4xf32> to vector<4x4x4xf32>
    %cst = arith.constant dense<0xFF800000> : vector<4xf32>
    %2 = vector.multi_reduction <maximumf>, %1, %cst [0, 1] : vector<4x4x4xf32> to vector<4xf32>
    %3 = vector.shape_cast %2 : vector<4xf32> to vector<1x4xf32>
    %c0_3 = arith.constant 0 : index
    %c5 = arith.constant 5 : index
    %c0_4 = arith.constant 0 : index
    %4 = vector.load %arg3[%c0_3, %c5, %c0_4] : memref<1x21x4xf32, #tpu.memory_space<vmem>>, vector<1x1x4xf32>
    %5 = vector.shape_cast %4 : vector<1x1x4xf32> to vector<1x4xf32>
    %6 = vector.shape_cast %3 : vector<1x4xf32> to vector<1x1x4xf32>
    tpu.vector_store %arg3[%c0_3, %c5, %c0_4], %6 {strides = array<i32>} : memref<1x21x4xf32, #tpu.memory_space<vmem>>, vector<1x1x4xf32>,
    %c0_5 = arith.constant 0 : index
    %c0_6 = arith.constant 0 : index
    %c4 = arith.constant 4 : index
    %c0_7 = arith.constant 0 : index
    %7 = vector.load %arg2[%c0_5, %c0_6, %c4, %c0_7] : memref<1x16x16x4xf32, #tpu.memory_space<vmem>>, vector<1x4x4x4xf32>
    %8 = vector.shape_cast %7 : vector<1x4x4x4xf32> to vector<4x4x4xf32>
    %cst_8 = arith.constant dense<0xFF800000> : vector<4xf32>
    %9 = vector.multi_reduction <maximumf>, %8, %cst_8 [0, 1] : vector<4x4x4xf32> to vector<4xf32>
    %10 = vector.shape_cast %9 : vector<4xf32> to vector<1x4xf32>
    %c0_9 = arith.constant 0 : index
    %c6 = arith.constant 6 : index
    %c0_10 = arith.constant 0 : index
    %11 = vector.load %arg3[%c0_9, %c6, %c0_10] : memref<1x21x4xf32, #tpu.memory_space<vmem>>, vector<1x1x4xf32>
    %12 = vector.shape_cast %11 : vector<1x1x4xf32> to vector<1x4xf32>
    %13 = vector.shape_cast %10 : vector<1x4xf32> to vector<1x1x4xf32>
    tpu.vector_store %arg3[%c0_9, %c6, %c0_10], %13 {strides = array<i32>} : memref<1x21x4xf32, #tpu.memory_space<vmem>>, vector<1x1x4xf32>,
    %c0_11 = arith.constant 0 : index
    %c0_12 = arith.constant 0 : index
    %c8 = arith.constant 8 : index
    %c0_13 = arith.constant 0 : index
    %14 = vector.load %arg2[%c0_11, %c0_12, %c8, %c0_13] : memref<1x16x16x4xf32, #tpu.memory_space<vmem>>, vector<1x4x4x4xf32>
    %15 = vector.shape_cast %14 : vector<1x4x4x4xf32> to vector<4x4x4xf32>
    %cst_14 = arith.constant dense<0xFF800000> : vector<4xf32>
    %16 = vector.multi_reduction <maximumf>, %15, %cst_14 [0, 1] : vector<4x4x4xf32> to vector<4xf32>
    %17 = vector.shape_cast %16 : vector<4xf32> to vector<1x4xf32>
    %c0_15 = arith.constant 0 : index
    %c7 = arith.constant 7 : index
    %c0_16 = arith.constant 0 : index
    %18 = vector.load %arg3[%c0_15, %c7, %c0_16] : memref<1x21x4xf32, #tpu.memory_space<vmem>>, vector<1x1x4xf32>
    %19 = vector.shape_cast %18 : vector<1x1x4xf32> to vector<1x4xf32>
    %20 = vector.shape_cast %17 : vector<1x4xf32> to vector<1x1x4xf32>
    tpu.vector_store %arg3[%c0_15, %c7, %c0_16], %20 {strides = array<i32>} : memref<1x21x4xf32, #tpu.memory_space<vmem>>, vector<1x1x4xf32>,
    %c0_17 = arith.constant 0 : index
    %c0_18 = arith.constant 0 : index
    %c12 = arith.constant 12 : index
    %c0_19 = arith.constant 0 : index
    %21 = vector.load %arg2[%c0_17, %c0_18, %c12, %c0_19] : memref<1x16x16x4xf32, #tpu.memory_space<vmem>>, vector<1x4x4x4xf32>
    %22 = vector.shape_cast %21 : vector<1x4x4x4xf32> to vector<4x4x4xf32>
    %cst_20 = arith.constant dense<0xFF800000> : vector<4xf32>
    %23 = vector.multi_reduction <maximumf>, %22, %cst_20 [0, 1] : vector<4x4x4xf32> to vector<4xf32>
    %24 = vector.shape_cast %23 : vector<4xf32> to vector<1x4xf32>
    %c0_21 = arith.constant 0 : index
    %c8_22 = arith.constant 8 : index
    %c0_23 = arith.constant 0 : index
    %25 = vector.load %arg3[%c0_21, %c8_22, %c0_23] : memref<1x21x4xf32, #tpu.memory_space<vmem>>, vector<1x1x4xf32>
    %26 = vector.shape_cast %25 : vector<1x1x4xf32> to vector<1x4xf32>
    %27 = vector.shape_cast %24 : vector<1x4xf32> to vector<1x1x4xf32>
    tpu.vector_store %arg3[%c0_21, %c8_22, %c0_23], %27 {strides = array<i32>} : memref<1x21x4xf32, #tpu.memory_space<vmem>>, vector<1x1x4xf32>,
    %c0_24 = arith.constant 0 : index
    %c4_25 = arith.constant 4 : index
    %c0_26 = arith.constant 0 : index
    %c0_27 = arith.constant 0 : index
    %28 = vector.load %arg2[%c0_24, %c4_25, %c0_26, %c0_27] : memref<1x16x16x4xf32, #tpu.memory_space<vmem>>, vector<1x4x4x4xf32>
    %29 = vector.shape_cast %28 : vector<1x4x4x4xf32> to vector<4x4x4xf32>
    %cst_28 = arith.constant dense<0xFF800000> : vector<4xf32>
    %30 = vector.multi_reduction <maximumf>, %29, %cst_28 [0, 1] : vector<4x4x4xf32> to vector<4xf32>
    %31 = vector.shape_cast %30 : vector<4xf32> to vector<1x4xf32>
    %c0_29 = arith.constant 0 : index
    %c9 = arith.constant 9 : index
    %c0_30 = arith.constant 0 : index
    %32 = vector.load %arg3[%c0_29, %c9, %c0_30] : memref<1x21x4xf32, #tpu.memory_space<vmem>>, vector<1x1x4xf32>
    %33 = vector.shape_cast %32 : vector<1x1x4xf32> to vector<1x4xf32>
    %34 = vector.shape_cast %31 : vector<1x4xf32> to vector<1x1x4xf32>
    tpu.vector_store %arg3[%c0_29, %c9, %c0_30], %34 {strides = array<i32>} : memref<1x21x4xf32, #tpu.memory_space<vmem>>, vector<1x1x4xf32>,
    %c0_31 = arith.constant 0 : index
    %c4_32 = arith.constant 4 : index
    %c4_33 = arith.constant 4 : index
    %c0_34 = arith.constant 0 : index
    %35 = vector.load %arg2[%c0_31, %c4_32, %c4_33, %c0_34] : memref<1x16x16x4xf32, #tpu.memory_space<vmem>>, vector<1x4x4x4xf32>
    %36 = vector.shape_cast %35 : vector<1x4x4x4xf32> to vector<4x4x4xf32>
    %cst_35 = arith.constant dense<0xFF800000> : vector<4xf32>
    %37 = vector.multi_reduction <maximumf>, %36, %cst_35 [0, 1] : vector<4x4x4xf32> to vector<4xf32>
    %38 = vector.shape_cast %37 : vector<4xf32> to vector<1x4xf32>
    %c0_36 = arith.constant 0 : index
    %c10 = arith.constant 10 : index
    %c0_37 = arith.constant 0 : index
    %39 = vector.load %arg3[%c0_36, %c10, %c0_37] : memref<1x21x4xf32, #tpu.memory_space<vmem>>, vector<1x1x4xf32>
    %40 = vector.shape_cast %39 : vector<1x1x4xf32> to vector<1x4xf32>
    %41 = vector.shape_cast %38 : vector<1x4xf32> to vector<1x1x4xf32>
    tpu.vector_store %arg3[%c0_36, %c10, %c0_37], %41 {strides = array<i32>} : memref<1x21x4xf32, #tpu.memory_space<vmem>>, vector<1x1x4xf32>,
    %c0_38 = arith.constant 0 : index
    %c4_39 = arith.constant 4 : index
    %c8_40 = arith.constant 8 : index
    %c0_41 = arith.constant 0 : index
    %42 = vector.load %arg2[%c0_38, %c4_39, %c8_40, %c0_41] : memref<1x16x16x4xf32, #tpu.memory_space<vmem>>, vector<1x4x4x4xf32>
    %43 = vector.shape_cast %42 : vector<1x4x4x4xf32> to vector<4x4x4xf32>
    %cst_42 = arith.constant dense<0xFF800000> : vector<4xf32>
    %44 = vector.multi_reduction <maximumf>, %43, %cst_42 [0, 1] : vector<4x4x4xf32> to vector<4xf32>
    %45 = vector.shape_cast %44 : vector<4xf32> to vector<1x4xf32>
    %c0_43 = arith.constant 0 : index
    %c11 = arith.constant 11 : index
    %c0_44 = arith.constant 0 : index
    %46 = vector.load %arg3[%c0_43, %c11, %c0_44] : memref<1x21x4xf32, #tpu.memory_space<vmem>>, vector<1x1x4xf32>
    %47 = vector.shape_cast %46 : vector<1x1x4xf32> to vector<1x4xf32>
    %48 = vector.shape_cast %45 : vector<1x4xf32> to vector<1x1x4xf32>
    tpu.vector_store %arg3[%c0_43, %c11, %c0_44], %48 {strides = array<i32>} : memref<1x21x4xf32, #tpu.memory_space<vmem>>, vector<1x1x4xf32>,
    %c0_45 = arith.constant 0 : index
    %c4_46 = arith.constant 4 : index
    %c12_47 = arith.constant 12 : index
    %c0_48 = arith.constant 0 : index
    %49 = vector.load %arg2[%c0_45, %c4_46, %c12_47, %c0_48] : memref<1x16x16x4xf32, #tpu.memory_space<vmem>>, vector<1x4x4x4xf32>
    %50 = vector.shape_cast %49 : vector<1x4x4x4xf32> to vector<4x4x4xf32>
    %cst_49 = arith.constant dense<0xFF800000> : vector<4xf32>
    %51 = vector.multi_reduction <maximumf>, %50, %cst_49 [0, 1] : vector<4x4x4xf32> to vector<4xf32>
    %52 = vector.shape_cast %51 : vector<4xf32> to vector<1x4xf32>
    %c0_50 = arith.constant 0 : index
    %c12_51 = arith.constant 12 : index
    %c0_52 = arith.constant 0 : index
    %53 = vector.load %arg3[%c0_50, %c12_51, %c0_52] : memref<1x21x4xf32, #tpu.memory_space<vmem>>, vector<1x1x4xf32>
    %54 = vector.shape_cast %53 : vector<1x1x4xf32> to vector<1x4xf32>
    %55 = vector.shape_cast %52 : vector<1x4xf32> to vector<1x1x4xf32>
    tpu.vector_store %arg3[%c0_50, %c12_51, %c0_52], %55 {strides = array<i32>} : memref<1x21x4xf32, #tpu.memory_space<vmem>>, vector<1x1x4xf32>,
    %c0_53 = arith.constant 0 : index
    %c8_54 = arith.constant 8 : index
    %c0_55 = arith.constant 0 : index
    %c0_56 = arith.constant 0 : index
    %56 = vector.load %arg2[%c0_53, %c8_54, %c0_55, %c0_56] : memref<1x16x16x4xf32, #tpu.memory_space<vmem>>, vector<1x4x4x4xf32>
    %57 = vector.shape_cast %56 : vector<1x4x4x4xf32> to vector<4x4x4xf32>
    %cst_57 = arith.constant dense<0xFF800000> : vector<4xf32>
    %58 = vector.multi_reduction <maximumf>, %57, %cst_57 [0, 1] : vector<4x4x4xf32> to vector<4xf32>
    %59 = vector.shape_cast %58 : vector<4xf32> to vector<1x4xf32>
    %c0_58 = arith.constant 0 : index
    %c13 = arith.constant 13 : index
    %c0_59 = arith.constant 0 : index
    %60 = vector.load %arg3[%c0_58, %c13, %c0_59] : memref<1x21x4xf32, #tpu.memory_space<vmem>>, vector<1x1x4xf32>
    %61 = vector.shape_cast %60 : vector<1x1x4xf32> to vector<1x4xf32>
    %62 = vector.shape_cast %59 : vector<1x4xf32> to vector<1x1x4xf32>
    tpu.vector_store %arg3[%c0_58, %c13, %c0_59], %62 {strides = array<i32>} : memref<1x21x4xf32, #tpu.memory_space<vmem>>, vector<1x1x4xf32>,
    %c0_60 = arith.constant 0 : index
    %c8_61 = arith.constant 8 : index
    %c4_62 = arith.constant 4 : index
    %c0_63 = arith.constant 0 : index
    %63 = vector.load %arg2[%c0_60, %c8_61, %c4_62, %c0_63] : memref<1x16x16x4xf32, #tpu.memory_space<vmem>>, vector<1x4x4x4xf32>
    %64 = vector.shape_cast %63 : vector<1x4x4x4xf32> to vector<4x4x4xf32>
    %cst_64 = arith.constant dense<0xFF800000> : vector<4xf32>
    %65 = vector.multi_reduction <maximumf>, %64, %cst_64 [0, 1] : vector<4x4x4xf32> to vector<4xf32>
    %66 = vector.shape_cast %65 : vector<4xf32> to vector<1x4xf32>
    %c0_65 = arith.constant 0 : index
    %c14 = arith.constant 14 : index
    %c0_66 = arith.constant 0 : index
    %67 = vector.load %arg3[%c0_65, %c14, %c0_66] : memref<1x21x4xf32, #tpu.memory_space<vmem>>, vector<1x1x4xf32>
    %68 = vector.shape_cast %67 : vector<1x1x4xf32> to vector<1x4xf32>
    %69 = vector.shape_cast %66 : vector<1x4xf32> to vector<1x1x4xf32>
    tpu.vector_store %arg3[%c0_65, %c14, %c0_66], %69 {strides = array<i32>} : memref<1x21x4xf32, #tpu.memory_space<vmem>>, vector<1x1x4xf32>,
    %c0_67 = arith.constant 0 : index
    %c8_68 = arith.constant 8 : index
    %c8_69 = arith.constant 8 : index
    %c0_70 = arith.constant 0 : index
    %70 = vector.load %arg2[%c0_67, %c8_68, %c8_69, %c0_70] : memref<1x16x16x4xf32, #tpu.memory_space<vmem>>, vector<1x4x4x4xf32>
    %71 = vector.shape_cast %70 : vector<1x4x4x4xf32> to vector<4x4x4xf32>
    %cst_71 = arith.constant dense<0xFF800000> : vector<4xf32>
    %72 = vector.multi_reduction <maximumf>, %71, %cst_71 [0, 1] : vector<4x4x4xf32> to vector<4xf32>
    %73 = vector.shape_cast %72 : vector<4xf32> to vector<1x4xf32>
    %c0_72 = arith.constant 0 : index
    %c15 = arith.constant 15 : index
    %c0_73 = arith.constant 0 : index
    %74 = vector.load %arg3[%c0_72, %c15, %c0_73] : memref<1x21x4xf32, #tpu.memory_space<vmem>>, vector<1x1x4xf32>
    %75 = vector.shape_cast %74 : vector<1x1x4xf32> to vector<1x4xf32>
    %76 = vector.shape_cast %73 : vector<1x4xf32> to vector<1x1x4xf32>
    tpu.vector_store %arg3[%c0_72, %c15, %c0_73], %76 {strides = array<i32>} : memref<1x21x4xf32, #tpu.memory_space<vmem>>, vector<1x1x4xf32>,
    %c0_74 = arith.constant 0 : index
    %c8_75 = arith.constant 8 : index
    %c12_76 = arith.constant 12 : index
    %c0_77 = arith.constant 0 : index
    %77 = vector.load %arg2[%c0_74, %c8_75, %c12_76, %c0_77] : memref<1x16x16x4xf32, #tpu.memory_space<vmem>>, vector<1x4x4x4xf32>
    %78 = vector.shape_cast %77 : vector<1x4x4x4xf32> to vector<4x4x4xf32>
    %cst_78 = arith.constant dense<0xFF800000> : vector<4xf32>
    %79 = vector.multi_reduction <maximumf>, %78, %cst_78 [0, 1] : vector<4x4x4xf32> to vector<4xf32>
    %80 = vector.shape_cast %79 : vector<4xf32> to vector<1x4xf32>
    %c0_79 = arith.constant 0 : index
    %c16 = arith.constant 16 : index
    %c0_80 = arith.constant 0 : index
    %81 = vector.load %arg3[%c0_79, %c16, %c0_80] : memref<1x21x4xf32, #tpu.memory_space<vmem>>, vector<1x1x4xf32>
    %82 = vector.shape_cast %81 : vector<1x1x4xf32> to vector<1x4xf32>
    %83 = vector.shape_cast %80 : vector<1x4xf32> to vector<1x1x4xf32>
    tpu.vector_store %arg3[%c0_79, %c16, %c0_80], %83 {strides = array<i32>} : memref<1x21x4xf32, #tpu.memory_space<vmem>>, vector<1x1x4xf32>,
    %c0_81 = arith.constant 0 : index
    %c12_82 = arith.constant 12 : index
    %c0_83 = arith.constant 0 : index
    %c0_84 = arith.constant 0 : index
    %84 = vector.load %arg2[%c0_81, %c12_82, %c0_83, %c0_84] : memref<1x16x16x4xf32, #tpu.memory_space<vmem>>, vector<1x4x4x4xf32>
    %85 = vector.shape_cast %84 : vector<1x4x4x4xf32> to vector<4x4x4xf32>
    %cst_85 = arith.constant dense<0xFF800000> : vector<4xf32>
    %86 = vector.multi_reduction <maximumf>, %85, %cst_85 [0, 1] : vector<4x4x4xf32> to vector<4xf32>
    %87 = vector.shape_cast %86 : vector<4xf32> to vector<1x4xf32>
    %c0_86 = arith.constant 0 : index
    %c17 = arith.constant 17 : index
    %c0_87 = arith.constant 0 : index
    %88 = vector.load %arg3[%c0_86, %c17, %c0_87] : memref<1x21x4xf32, #tpu.memory_space<vmem>>, vector<1x1x4xf32>
    %89 = vector.shape_cast %88 : vector<1x1x4xf32> to vector<1x4xf32>
    %90 = vector.shape_cast %87 : vector<1x4xf32> to vector<1x1x4xf32>
    tpu.vector_store %arg3[%c0_86, %c17, %c0_87], %90 {strides = array<i32>} : memref<1x21x4xf32, #tpu.memory_space<vmem>>, vector<1x1x4xf32>,
    %c0_88 = arith.constant 0 : index
    %c12_89 = arith.constant 12 : index
    %c4_90 = arith.constant 4 : index
    %c0_91 = arith.constant 0 : index
    %91 = vector.load %arg2[%c0_88, %c12_89, %c4_90, %c0_91] : memref<1x16x16x4xf32, #tpu.memory_space<vmem>>, vector<1x4x4x4xf32>
    %92 = vector.shape_cast %91 : vector<1x4x4x4xf32> to vector<4x4x4xf32>
    %cst_92 = arith.constant dense<0xFF800000> : vector<4xf32>
    %93 = vector.multi_reduction <maximumf>, %92, %cst_92 [0, 1] : vector<4x4x4xf32> to vector<4xf32>
    %94 = vector.shape_cast %93 : vector<4xf32> to vector<1x4xf32>
    %c0_93 = arith.constant 0 : index
    %c18 = arith.constant 18 : index
    %c0_94 = arith.constant 0 : index
    %95 = vector.load %arg3[%c0_93, %c18, %c0_94] : memref<1x21x4xf32, #tpu.memory_space<vmem>>, vector<1x1x4xf32>
    %96 = vector.shape_cast %95 : vector<1x1x4xf32> to vector<1x4xf32>
    %97 = vector.shape_cast %94 : vector<1x4xf32> to vector<1x1x4xf32>
    tpu.vector_store %arg3[%c0_93, %c18, %c0_94], %97 {strides = array<i32>} : memref<1x21x4xf32, #tpu.memory_space<vmem>>, vector<1x1x4xf32>,
    %c0_95 = arith.constant 0 : index
    %c12_96 = arith.constant 12 : index
    %c8_97 = arith.constant 8 : index
    %c0_98 = arith.constant 0 : index
    %98 = vector.load %arg2[%c0_95, %c12_96, %c8_97, %c0_98] : memref<1x16x16x4xf32, #tpu.memory_space<vmem>>, vector<1x4x4x4xf32>
    %99 = vector.shape_cast %98 : vector<1x4x4x4xf32> to vector<4x4x4xf32>
    %cst_99 = arith.constant dense<0xFF800000> : vector<4xf32>
    %100 = vector.multi_reduction <maximumf>, %99, %cst_99 [0, 1] : vector<4x4x4xf32> to vector<4xf32>
    %101 = vector.shape_cast %100 : vector<4xf32> to vector<1x4xf32>
    %c0_100 = arith.constant 0 : index
    %c19 = arith.constant 19 : index
    %c0_101 = arith.constant 0 : index
    %102 = vector.load %arg3[%c0_100, %c19, %c0_101] : memref<1x21x4xf32, #tpu.memory_space<vmem>>, vector<1x1x4xf32>
    %103 = vector.shape_cast %102 : vector<1x1x4xf32> to vector<1x4xf32>
    %104 = vector.shape_cast %101 : vector<1x4xf32> to vector<1x1x4xf32>
    tpu.vector_store %arg3[%c0_100, %c19, %c0_101], %104 {strides = array<i32>} : memref<1x21x4xf32, #tpu.memory_space<vmem>>, vector<1x1x4xf32>,
    %c0_102 = arith.constant 0 : index
    %c12_103 = arith.constant 12 : index
    %c12_104 = arith.constant 12 : index
    %c0_105 = arith.constant 0 : index
    %105 = vector.load %arg2[%c0_102, %c12_103, %c12_104, %c0_105] : memref<1x16x16x4xf32, #tpu.memory_space<vmem>>, vector<1x4x4x4xf32>
    %106 = vector.shape_cast %105 : vector<1x4x4x4xf32> to vector<4x4x4xf32>
    %cst_106 = arith.constant dense<0xFF800000> : vector<4xf32>
    %107 = vector.multi_reduction <maximumf>, %106, %cst_106 [0, 1] : vector<4x4x4xf32> to vector<4xf32>
    %108 = vector.shape_cast %107 : vector<4xf32> to vector<1x4xf32>
    %c0_107 = arith.constant 0 : index
    %c20 = arith.constant 20 : index
    %c0_108 = arith.constant 0 : index
    %109 = vector.load %arg3[%c0_107, %c20, %c0_108] : memref<1x21x4xf32, #tpu.memory_space<vmem>>, vector<1x1x4xf32>
    %110 = vector.shape_cast %109 : vector<1x1x4xf32> to vector<1x4xf32>
    %111 = vector.shape_cast %108 : vector<1x4xf32> to vector<1x1x4xf32>
    tpu.vector_store %arg3[%c0_107, %c20, %c0_108], %111 {strides = array<i32>} : memref<1x21x4xf32, #tpu.memory_space<vmem>>, vector<1x1x4xf32>,
    %c0_109 = arith.constant 0 : index
    %c5_110 = arith.constant 5 : index
    %c0_111 = arith.constant 0 : index
    %112 = vector.load %arg3[%c0_109, %c5_110, %c0_111] : memref<1x21x4xf32, #tpu.memory_space<vmem>>, vector<1x1x4xf32>
    %113 = vector.shape_cast %112 : vector<1x1x4xf32> to vector<1x4xf32>
    %c0_112 = arith.constant 0 : index
    %c6_113 = arith.constant 6 : index
    %c0_114 = arith.constant 0 : index
    %114 = vector.load %arg3[%c0_112, %c6_113, %c0_114] : memref<1x21x4xf32, #tpu.memory_space<vmem>>, vector<1x1x4xf32>
    %115 = vector.shape_cast %114 : vector<1x1x4xf32> to vector<1x4xf32>
    %116 = arith.maximumf %113, %115 : vector<1x4xf32>
    %c0_115 = arith.constant 0 : index
    %c7_116 = arith.constant 7 : index
    %c0_117 = arith.constant 0 : index
    %117 = vector.load %arg3[%c0_115, %c7_116, %c0_117] : memref<1x21x4xf32, #tpu.memory_space<vmem>>, vector<1x1x4xf32>
    %118 = vector.shape_cast %117 : vector<1x1x4xf32> to vector<1x4xf32>
    %119 = arith.maximumf %116, %118 : vector<1x4xf32>
    %c0_118 = arith.constant 0 : index
    %c8_119 = arith.constant 8 : index
    %c0_120 = arith.constant 0 : index
    %120 = vector.load %arg3[%c0_118, %c8_119, %c0_120] : memref<1x21x4xf32, #tpu.memory_space<vmem>>, vector<1x1x4xf32>
    %121 = vector.shape_cast %120 : vector<1x1x4xf32> to vector<1x4xf32>
    %122 = arith.maximumf %119, %121 : vector<1x4xf32>
    %c0_121 = arith.constant 0 : index
    %c9_122 = arith.constant 9 : index
    %c0_123 = arith.constant 0 : index
    %123 = vector.load %arg3[%c0_121, %c9_122, %c0_123] : memref<1x21x4xf32, #tpu.memory_space<vmem>>, vector<1x1x4xf32>
    %124 = vector.shape_cast %123 : vector<1x1x4xf32> to vector<1x4xf32>
    %125 = arith.maximumf %122, %124 : vector<1x4xf32>
    %c0_124 = arith.constant 0 : index
    %c10_125 = arith.constant 10 : index
    %c0_126 = arith.constant 0 : index
    %126 = vector.load %arg3[%c0_124, %c10_125, %c0_126] : memref<1x21x4xf32, #tpu.memory_space<vmem>>, vector<1x1x4xf32>
    %127 = vector.shape_cast %126 : vector<1x1x4xf32> to vector<1x4xf32>
    %128 = arith.maximumf %125, %127 : vector<1x4xf32>
    %c0_127 = arith.constant 0 : index
    %c11_128 = arith.constant 11 : index
    %c0_129 = arith.constant 0 : index
    %129 = vector.load %arg3[%c0_127, %c11_128, %c0_129] : memref<1x21x4xf32, #tpu.memory_space<vmem>>, vector<1x1x4xf32>
    %130 = vector.shape_cast %129 : vector<1x1x4xf32> to vector<1x4xf32>
    %131 = arith.maximumf %128, %130 : vector<1x4xf32>
    %c0_130 = arith.constant 0 : index
    %c12_131 = arith.constant 12 : index
    %c0_132 = arith.constant 0 : index
    %132 = vector.load %arg3[%c0_130, %c12_131, %c0_132] : memref<1x21x4xf32, #tpu.memory_space<vmem>>, vector<1x1x4xf32>
    %133 = vector.shape_cast %132 : vector<1x1x4xf32> to vector<1x4xf32>
    %134 = arith.maximumf %131, %133 : vector<1x4xf32>
    %c0_133 = arith.constant 0 : index
    %c13_134 = arith.constant 13 : index
    %c0_135 = arith.constant 0 : index
    %135 = vector.load %arg3[%c0_133, %c13_134, %c0_135] : memref<1x21x4xf32, #tpu.memory_space<vmem>>, vector<1x1x4xf32>
    %136 = vector.shape_cast %135 : vector<1x1x4xf32> to vector<1x4xf32>
    %137 = arith.maximumf %134, %136 : vector<1x4xf32>
    %c0_136 = arith.constant 0 : index
    %c14_137 = arith.constant 14 : index
    %c0_138 = arith.constant 0 : index
    %138 = vector.load %arg3[%c0_136, %c14_137, %c0_138] : memref<1x21x4xf32, #tpu.memory_space<vmem>>, vector<1x1x4xf32>
    %139 = vector.shape_cast %138 : vector<1x1x4xf32> to vector<1x4xf32>
    %140 = arith.maximumf %137, %139 : vector<1x4xf32>
    %c0_139 = arith.constant 0 : index
    %c15_140 = arith.constant 15 : index
    %c0_141 = arith.constant 0 : index
    %141 = vector.load %arg3[%c0_139, %c15_140, %c0_141] : memref<1x21x4xf32, #tpu.memory_space<vmem>>, vector<1x1x4xf32>
    %142 = vector.shape_cast %141 : vector<1x1x4xf32> to vector<1x4xf32>
    %143 = arith.maximumf %140, %142 : vector<1x4xf32>
    %c0_142 = arith.constant 0 : index
    %c16_143 = arith.constant 16 : index
    %c0_144 = arith.constant 0 : index
    %144 = vector.load %arg3[%c0_142, %c16_143, %c0_144] : memref<1x21x4xf32, #tpu.memory_space<vmem>>, vector<1x1x4xf32>
    %145 = vector.shape_cast %144 : vector<1x1x4xf32> to vector<1x4xf32>
    %146 = arith.maximumf %143, %145 : vector<1x4xf32>
    %c0_145 = arith.constant 0 : index
    %c17_146 = arith.constant 17 : index
    %c0_147 = arith.constant 0 : index
    %147 = vector.load %arg3[%c0_145, %c17_146, %c0_147] : memref<1x21x4xf32, #tpu.memory_space<vmem>>, vector<1x1x4xf32>
    %148 = vector.shape_cast %147 : vector<1x1x4xf32> to vector<1x4xf32>
    %149 = arith.maximumf %146, %148 : vector<1x4xf32>
    %c0_148 = arith.constant 0 : index
    %c18_149 = arith.constant 18 : index
    %c0_150 = arith.constant 0 : index
    %150 = vector.load %arg3[%c0_148, %c18_149, %c0_150] : memref<1x21x4xf32, #tpu.memory_space<vmem>>, vector<1x1x4xf32>
    %151 = vector.shape_cast %150 : vector<1x1x4xf32> to vector<1x4xf32>
    %152 = arith.maximumf %149, %151 : vector<1x4xf32>
    %c0_151 = arith.constant 0 : index
    %c19_152 = arith.constant 19 : index
    %c0_153 = arith.constant 0 : index
    %153 = vector.load %arg3[%c0_151, %c19_152, %c0_153] : memref<1x21x4xf32, #tpu.memory_space<vmem>>, vector<1x1x4xf32>
    %154 = vector.shape_cast %153 : vector<1x1x4xf32> to vector<1x4xf32>
    %155 = arith.maximumf %152, %154 : vector<1x4xf32>
    %c0_154 = arith.constant 0 : index
    %c20_155 = arith.constant 20 : index
    %c0_156 = arith.constant 0 : index
    %156 = vector.load %arg3[%c0_154, %c20_155, %c0_156] : memref<1x21x4xf32, #tpu.memory_space<vmem>>, vector<1x1x4xf32>
    %157 = vector.shape_cast %156 : vector<1x1x4xf32> to vector<1x4xf32>
    %158 = arith.maximumf %155, %157 : vector<1x4xf32>
    %c0_157 = arith.constant 0 : index
    %c0_158 = arith.constant 0 : index
    %c0_159 = arith.constant 0 : index
    %159 = vector.load %arg3[%c0_157, %c0_158, %c0_159] : memref<1x21x4xf32, #tpu.memory_space<vmem>>, vector<1x1x4xf32>
    %160 = vector.shape_cast %159 : vector<1x1x4xf32> to vector<1x4xf32>
    %161 = vector.shape_cast %158 : vector<1x4xf32> to vector<1x1x4xf32>
    tpu.vector_store %arg3[%c0_157, %c0_158, %c0_159], %161 {strides = array<i32>} : memref<1x21x4xf32, #tpu.memory_space<vmem>>, vector<1x1x4xf32>,
    %c0_160 = arith.constant 0 : index
    %c5_161 = arith.constant 5 : index
    %c0_162 = arith.constant 0 : index
    %162 = vector.load %arg3[%c0_160, %c5_161, %c0_162] : memref<1x21x4xf32, #tpu.memory_space<vmem>>, vector<1x1x4xf32>
    %163 = vector.shape_cast %162 : vector<1x1x4xf32> to vector<1x4xf32>
    %c0_163 = arith.constant 0 : index
    %c6_164 = arith.constant 6 : index
    %c0_165 = arith.constant 0 : index
    %164 = vector.load %arg3[%c0_163, %c6_164, %c0_165] : memref<1x21x4xf32, #tpu.memory_space<vmem>>, vector<1x1x4xf32>
    %165 = vector.shape_cast %164 : vector<1x1x4xf32> to vector<1x4xf32>
    %166 = arith.maximumf %163, %165 : vector<1x4xf32>
    %c0_166 = arith.constant 0 : index
    %c9_167 = arith.constant 9 : index
    %c0_168 = arith.constant 0 : index
    %167 = vector.load %arg3[%c0_166, %c9_167, %c0_168] : memref<1x21x4xf32, #tpu.memory_space<vmem>>, vector<1x1x4xf32>
    %168 = vector.shape_cast %167 : vector<1x1x4xf32> to vector<1x4xf32>
    %169 = arith.maximumf %166, %168 : vector<1x4xf32>
    %c0_169 = arith.constant 0 : index
    %c10_170 = arith.constant 10 : index
    %c0_171 = arith.constant 0 : index
    %170 = vector.load %arg3[%c0_169, %c10_170, %c0_171] : memref<1x21x4xf32, #tpu.memory_space<vmem>>, vector<1x1x4xf32>
    %171 = vector.shape_cast %170 : vector<1x1x4xf32> to vector<1x4xf32>
    %172 = arith.maximumf %169, %171 : vector<1x4xf32>
    %c0_172 = arith.constant 0 : index
    %c1 = arith.constant 1 : index
    %c0_173 = arith.constant 0 : index
    %173 = vector.load %arg3[%c0_172, %c1, %c0_173] : memref<1x21x4xf32, #tpu.memory_space<vmem>>, vector<1x1x4xf32>
    %174 = vector.shape_cast %173 : vector<1x1x4xf32> to vector<1x4xf32>
    %175 = vector.shape_cast %172 : vector<1x4xf32> to vector<1x1x4xf32>
    tpu.vector_store %arg3[%c0_172, %c1, %c0_173], %175 {strides = array<i32>} : memref<1x21x4xf32, #tpu.memory_space<vmem>>, vector<1x1x4xf32>,
    %c0_174 = arith.constant 0 : index
    %c7_175 = arith.constant 7 : index
    %c0_176 = arith.constant 0 : index
    %176 = vector.load %arg3[%c0_174, %c7_175, %c0_176] : memref<1x21x4xf32, #tpu.memory_space<vmem>>, vector<1x1x4xf32>
    %177 = vector.shape_cast %176 : vector<1x1x4xf32> to vector<1x4xf32>
    %c0_177 = arith.constant 0 : index
    %c8_178 = arith.constant 8 : index
    %c0_179 = arith.constant 0 : index
    %178 = vector.load %arg3[%c0_177, %c8_178, %c0_179] : memref<1x21x4xf32, #tpu.memory_space<vmem>>, vector<1x1x4xf32>
    %179 = vector.shape_cast %178 : vector<1x1x4xf32> to vector<1x4xf32>
    %180 = arith.maximumf %177, %179 : vector<1x4xf32>
    %c0_180 = arith.constant 0 : index
    %c11_181 = arith.constant 11 : index
    %c0_182 = arith.constant 0 : index
    %181 = vector.load %arg3[%c0_180, %c11_181, %c0_182] : memref<1x21x4xf32, #tpu.memory_space<vmem>>, vector<1x1x4xf32>
    %182 = vector.shape_cast %181 : vector<1x1x4xf32> to vector<1x4xf32>
    %183 = arith.maximumf %180, %182 : vector<1x4xf32>
    %c0_183 = arith.constant 0 : index
    %c12_184 = arith.constant 12 : index
    %c0_185 = arith.constant 0 : index
    %184 = vector.load %arg3[%c0_183, %c12_184, %c0_185] : memref<1x21x4xf32, #tpu.memory_space<vmem>>, vector<1x1x4xf32>
    %185 = vector.shape_cast %184 : vector<1x1x4xf32> to vector<1x4xf32>
    %186 = arith.maximumf %183, %185 : vector<1x4xf32>
    %c0_186 = arith.constant 0 : index
    %c2 = arith.constant 2 : index
    %c0_187 = arith.constant 0 : index
    %187 = vector.load %arg3[%c0_186, %c2, %c0_187] : memref<1x21x4xf32, #tpu.memory_space<vmem>>, vector<1x1x4xf32>
    %188 = vector.shape_cast %187 : vector<1x1x4xf32> to vector<1x4xf32>
    %189 = vector.shape_cast %186 : vector<1x4xf32> to vector<1x1x4xf32>
    tpu.vector_store %arg3[%c0_186, %c2, %c0_187], %189 {strides = array<i32>} : memref<1x21x4xf32, #tpu.memory_space<vmem>>, vector<1x1x4xf32>,
    %c0_188 = arith.constant 0 : index
    %c13_189 = arith.constant 13 : index
    %c0_190 = arith.constant 0 : index
    %190 = vector.load %arg3[%c0_188, %c13_189, %c0_190] : memref<1x21x4xf32, #tpu.memory_space<vmem>>, vector<1x1x4xf32>
    %191 = vector.shape_cast %190 : vector<1x1x4xf32> to vector<1x4xf32>
    %c0_191 = arith.constant 0 : index
    %c14_192 = arith.constant 14 : index
    %c0_193 = arith.constant 0 : index
    %192 = vector.load %arg3[%c0_191, %c14_192, %c0_193] : memref<1x21x4xf32, #tpu.memory_space<vmem>>, vector<1x1x4xf32>
    %193 = vector.shape_cast %192 : vector<1x1x4xf32> to vector<1x4xf32>
    %194 = arith.maximumf %191, %193 : vector<1x4xf32>
    %c0_194 = arith.constant 0 : index
    %c17_195 = arith.constant 17 : index
    %c0_196 = arith.constant 0 : index
    %195 = vector.load %arg3[%c0_194, %c17_195, %c0_196] : memref<1x21x4xf32, #tpu.memory_space<vmem>>, vector<1x1x4xf32>
    %196 = vector.shape_cast %195 : vector<1x1x4xf32> to vector<1x4xf32>
    %197 = arith.maximumf %194, %196 : vector<1x4xf32>
    %c0_197 = arith.constant 0 : index
    %c18_198 = arith.constant 18 : index
    %c0_199 = arith.constant 0 : index
    %198 = vector.load %arg3[%c0_197, %c18_198, %c0_199] : memref<1x21x4xf32, #tpu.memory_space<vmem>>, vector<1x1x4xf32>
    %199 = vector.shape_cast %198 : vector<1x1x4xf32> to vector<1x4xf32>
    %200 = arith.maximumf %197, %199 : vector<1x4xf32>
    %c0_200 = arith.constant 0 : index
    %c3 = arith.constant 3 : index
    %c0_201 = arith.constant 0 : index
    %201 = vector.load %arg3[%c0_200, %c3, %c0_201] : memref<1x21x4xf32, #tpu.memory_space<vmem>>, vector<1x1x4xf32>
    %202 = vector.shape_cast %201 : vector<1x1x4xf32> to vector<1x4xf32>
    %203 = vector.shape_cast %200 : vector<1x4xf32> to vector<1x1x4xf32>
    tpu.vector_store %arg3[%c0_200, %c3, %c0_201], %203 {strides = array<i32>} : memref<1x21x4xf32, #tpu.memory_space<vmem>>, vector<1x1x4xf32>,
    %c0_202 = arith.constant 0 : index
    %c15_203 = arith.constant 15 : index
    %c0_204 = arith.constant 0 : index
    %204 = vector.load %arg3[%c0_202, %c15_203, %c0_204] : memref<1x21x4xf32, #tpu.memory_space<vmem>>, vector<1x1x4xf32>
    %205 = vector.shape_cast %204 : vector<1x1x4xf32> to vector<1x4xf32>
    %c0_205 = arith.constant 0 : index
    %c16_206 = arith.constant 16 : index
    %c0_207 = arith.constant 0 : index
    %206 = vector.load %arg3[%c0_205, %c16_206, %c0_207] : memref<1x21x4xf32, #tpu.memory_space<vmem>>, vector<1x1x4xf32>
    %207 = vector.shape_cast %206 : vector<1x1x4xf32> to vector<1x4xf32>
    %208 = arith.maximumf %205, %207 : vector<1x4xf32>
    %c0_208 = arith.constant 0 : index
    %c19_209 = arith.constant 19 : index
    %c0_210 = arith.constant 0 : index
    %209 = vector.load %arg3[%c0_208, %c19_209, %c0_210] : memref<1x21x4xf32, #tpu.memory_space<vmem>>, vector<1x1x4xf32>
    %210 = vector.shape_cast %209 : vector<1x1x4xf32> to vector<1x4xf32>
    %211 = arith.maximumf %208, %210 : vector<1x4xf32>
    %c0_211 = arith.constant 0 : index
    %c20_212 = arith.constant 20 : index
    %c0_213 = arith.constant 0 : index
    %212 = vector.load %arg3[%c0_211, %c20_212, %c0_213] : memref<1x21x4xf32, #tpu.memory_space<vmem>>, vector<1x1x4xf32>
    %213 = vector.shape_cast %212 : vector<1x1x4xf32> to vector<1x4xf32>
    %214 = arith.maximumf %211, %213 : vector<1x4xf32>
    %c0_214 = arith.constant 0 : index
    %c4_215 = arith.constant 4 : index
    %c0_216 = arith.constant 0 : index
    %215 = vector.load %arg3[%c0_214, %c4_215, %c0_216] : memref<1x21x4xf32, #tpu.memory_space<vmem>>, vector<1x1x4xf32>
    %216 = vector.shape_cast %215 : vector<1x1x4xf32> to vector<1x4xf32>
    %217 = vector.shape_cast %214 : vector<1x4xf32> to vector<1x1x4xf32>
    tpu.vector_store %arg3[%c0_214, %c4_215, %c0_216], %217 {strides = array<i32>} : memref<1x21x4xf32, #tpu.memory_space<vmem>>, vector<1x1x4xf32>,
    return
  }
  func.func @transform_0(%arg0: i32, %arg1: i32) -> (i32, i32, i32, i32) {
    %c0_i32 = arith.constant 0 : i32
    %c0_i32_0 = arith.constant 0 : i32
    %c0_i32_1 = arith.constant 0 : i32
    return %arg0, %c0_i32, %c0_i32_0, %arg1 : i32, i32, i32, i32
  }
  func.func @transform_1(%arg0: i32, %arg1: i32) -> (i32, i32, i32) {
    %c0_i32 = arith.constant 0 : i32
    %c0_i32_0 = arith.constant 0 : i32
    return %arg0, %c0_i32, %arg1 : i32, i32, i32
  }
}

</mosaic_0001>

<bundles_post_ra>
// kernel: tpu_custom_call.1
= control target key start
LH: loop header
LB: loop body
LE: loop exit
PB: predicated region body
PF: predicated region fallthrough
CT: control target
= control target key end

     0   :  { %s706_s6 = smov 0   ;;  %s708_s7 = smov 0   ;;  %s958_s0 = inlined_call_operand.vmem [shape: f32[2,16,16,4], index: 0, kind: input, shape index: {}]   ;;  %s959_s1 = inlined_call_operand.vmem [shape: f32[2,21,4], index: 1, kind: output, shape index: {}]  }
   0x1   :  { %s710_s8 = smov 0  }
   0x2 LB: > { %s23_s9 = sadd.s32 1, %s690_s7  ;;  %p592_p0 = scmp.ge.s32.totalorder %s694_s8, 1  ;;  %s694_s8 = sphi %s710_s8, %s11_s8   ;;  %s690_s7 = sphi %s708_s7, %s961_s7   ;;  %s686_s6 = sphi %s706_s6, %s960_s6  }
   0x3   : > { %p25_p1 = scmp.ge.s32.totalorder %s23_s9, 2  ;;  %p106_p2 = scmp.lt.s32.totalorder %s694_s8, 3 }
   0x5   : > { %s963_s9 = smov (%p25_p1, %s23_s9), 0  ;;  %p107_p3 = pnand %p592_p0, %p106_p2 }
   0x6   : > { %p132_p4 = scmp.lt.s32.totalorder (!%p107_p3), %s686_s6, 1 }
   0x7   : > { %110 = sbr.rel (%p107_p3) target bundleno = 97 (0x61), region = 24 }
   0xc   : > { %s965_s6 = smov (!%p132_p4, %s686_s6), 1  ;;  %vm152_vm0 = vcmask 27648   ;;  %vm166_vm1 = vcmask 24576  }
   0xd   : > { %s646_s10 = sshll.u32 %s965_s6, 8  ;;  %s647_s14 = smul.u32 24, %s965_s6 }
   0xe   : > { %s730_s13 = scalar_lea.vmem %s958_s0, %s646_s10 }
   0xf   : > { %v148_v0 = vld [vmem:[%s730_s13] sm:$0xf]  ;;  %v149_v1 = vld [vmem:[%s730_s13 + $0x10] sm:$0xf]  ;;  %v168_v9 = vld [vmem:[%s730_s13 + $0x4] sm:$0xf]  ;;  %s786_s17 = scalar_lea.vmem %s959_s1, %s647_s14 }
  0x10   : > { %v150_v2 = vld [vmem:[%s730_s13 + $0x20] sm:$0xf]  ;;  %v151_v3 = vld [vmem:[%s730_s13 + $0x30] sm:$0xf]  ;;  %v153_v4 = vsel %vm152_vm0, %v148_v0, -inf  ;;  %v154_v5 = vsel %vm152_vm0, %v149_v1, -inf }
  0x11   : > { %v155_v6 = vsel %vm152_vm0, %v150_v2, -inf  ;;  %v156_v7 = vsel %vm152_vm0, %v151_v3, -inf  ;;  %v157_v8 = vmax.f32 %v153_v4, %v154_v5  ;;  %v169_v10 = vld [vmem:[%s730_s13 + $0x14] sm:$0xf]  ;;  %v170_v12 = vld [vmem:[%s730_s13 + $0x24] sm:$0xf] }
  0x12   : > { %v158_v11 = vmax.f32 %v155_v6, %v156_v7  ;;  %v171_v13 = vld [vmem:[%s730_s13 + $0x34] sm:$0xf]  ;;  %v172_v14 = vsel %vm152_vm0, %v168_v9, -inf  ;;  %v173_v15 = vsel %vm152_vm0, %v169_v10, -inf  ;;  %v174_v16 = vsel %vm152_vm0, %v170_v12, -inf }
  0x13   : > { %v175_v17 = vsel %vm152_vm0, %v171_v13, -inf  ;;  %v176_v18 = vmax.f32 %v172_v14, %v173_v15  ;;  %v186_v19 = vld [vmem:[%s730_s13 + $0x8] sm:$0xf]  ;;  %v187_v20 = vld [vmem:[%s730_s13 + $0x18] sm:$0xf] }
  0x14   : > { %v159_v21 = vmax.f32 %v157_v8, %v158_v11  ;;  %v177_v22 = vmax.f32 %v174_v16, %v175_v17  ;;  %v188_v23 = vld [vmem:[%s730_s13 + $0x28] sm:$0xf]  ;;  %v189_v24 = vld [vmem:[%s730_s13 + $0x38] sm:$0xf]  ;;  %v190_v25 = vsel %vm152_vm0, %v186_v19, -inf  ;;  %v191_v26 = vsel %vm152_vm0, %v187_v20, -inf }
  0x15   : > { %v192_v27 = vsel %vm152_vm0, %v188_v23, -inf  ;;  %v193_v28 = vsel %vm152_vm0, %v189_v24, -inf  ;;  %v194_v29 = vmax.f32 %v190_v25, %v191_v26  ;;  %v204_v30 = vld [vmem:[%s730_s13 + $0xc] sm:$0xf]  ;;  %v205_v31 = vld [vmem:[%s730_s13 + $0x1c] sm:$0xf] }
  0x16   : > { %v160_v32 = vrot.slane %v159_v21, 4  ;;  %v178_v33 = vmax.f32 %v176_v18, %v177_v22  ;;  %v195_v34 = vmax.f32 %v192_v27, %v193_v28  ;;  %v206_v35 = vld [vmem:[%s730_s13 + $0x2c] sm:$0xf]  ;;  %v207_v36 = vld [vmem:[%s730_s13 + $0x3c] sm:$0xf]  ;;  %v208_v37 = vsel %vm152_vm0, %v204_v30, -inf }
  0x17   : > { %v209_v38 = vsel %vm152_vm0, %v205_v31, -inf  ;;  %v210_v39 = vsel %vm152_vm0, %v206_v35, -inf  ;;  %v211_v40 = vsel %vm152_vm0, %v207_v36, -inf  ;;  %v596_v41 = vld [vmem:[%s730_s13 + $0x40] sm:$0xf] }
  0x18   : > { %v161_v42 = vmax.f32 %v159_v21, %v160_v32  ;;  %v179_v43 = vrot.slane %v178_v33, 4  ;;  %v196_v44 = vmax.f32 %v194_v29, %v195_v34  ;;  %v212_v45 = vmax.f32 %v208_v37, %v209_v38  ;;  %v597_v46 = vld [vmem:[%s730_s13 + $0x50] sm:$0xf]  ;;  %v598_v47 = vld [vmem:[%s730_s13 + $0x60] sm:$0xf] }
  0x19   : > { %v213_v48 = vmax.f32 %v210_v39, %v211_v40  ;;  %v599_v49 = vld [vmem:[%s730_s13 + $0x70] sm:$0xf]  ;;  %v227_v50 = vsel %vm152_vm0, %v596_v41, -inf  ;;  %v228_v51 = vsel %vm152_vm0, %v597_v46, -inf  ;;  %v229_v52 = vsel %vm152_vm0, %v598_v47, -inf }
  0x1a   : > { %v162_v53 = vrot.slane %v161_v42, 2  ;;  %v180_v54 = vmax.f32 %v178_v33, %v179_v43  ;;  %v197_v55 = vrot.slane %v196_v44, 4  ;;  %v230_v56 = vsel %vm152_vm0, %v599_v49, -inf  ;;  %v600_v57 = vld [vmem:[%s730_s13 + $0x44] sm:$0xf] }
  0x1b   : > { %v214_v58 = vmax.f32 %v212_v45, %v213_v48  ;;  %v231_v59 = vmax.f32 %v227_v50, %v228_v51  ;;  %v232_v60 = vmax.f32 %v229_v52, %v230_v56  ;;  %v601_v61 = vld [vmem:[%s730_s13 + $0x54] sm:$0xf]  ;;  %v602_v62 = vld [vmem:[%s730_s13 + $0x64] sm:$0xf]  ;;  %v245_v3 = vsel %vm152_vm0, %v600_v57, -inf }
  0x1c   : > { %v603_v63 = vld [vmem:[%s730_s13 + $0x74] sm:$0xf]  ;;  %v163_v0 = vmax.f32 %v161_v42, %v162_v53  ;;  %v181_v1 = vrot.slane %v180_v54, 2  ;;  %v198_v2 = vmax.f32 %v196_v44, %v197_v55  ;;  %v246_v6 = vsel %vm152_vm0, %v601_v61, -inf  ;;  %v604_v8 = vld [vmem:[%s730_s13 + $0x48] sm:$0xf] }
  0x1d   : > { %v215_v4 = vrot.slane %v214_v58, 4  ;;  %v233_v5 = vmax.f32 %v231_v59, %v232_v60  ;;  %v247_v7 = vsel %vm152_vm0, %v602_v62, -inf  ;;  %v248_v12 = vsel %vm152_vm0, %v603_v63, -inf  ;;  %v605_v13 = vld [vmem:[%s730_s13 + $0x58] sm:$0xf] }
  0x1e   : > { %v164_v9 = vrot.slane %v163_v0, 1  ;;  %v182_v10 = vmax.f32 %v180_v54, %v181_v1  ;;  %v199_v11 = vrot.slane %v198_v2, 2  ;;  %v249_v16 = vmax.f32 %v245_v3, %v246_v6  ;;  %v606_v18 = vld [vmem:[%s730_s13 + $0x68] sm:$0xf]  ;;  %v607_v19 = vld [vmem:[%s730_s13 + $0x78] sm:$0xf] }
  0x1f   : > { %v216_v14 = vmax.f32 %v214_v58, %v215_v4  ;;  %v234_v15 = vrot.slane %v233_v5, 4  ;;  %v250_v17 = vmax.f32 %v247_v7, %v248_v12  ;;  %v263_v23 = vsel %vm152_vm0, %v604_v8, -inf  ;;  %v608_v24 = vld [vmem:[%s730_s13 + $0x4c] sm:$0xf]  ;;  %v609_v29 = vld [vmem:[%s730_s13 + $0x5c] sm:$0xf] }
  0x20   : > { %v165_v20 = vmax.f32 %v163_v0, %v164_v9  ;;  %v183_v21 = vrot.slane %v182_v10, 1  ;;  %v200_v22 = vmax.f32 %v198_v2, %v199_v11  ;;  %v264_v28 = vsel %vm152_vm0, %v605_v13, -inf  ;;  %v610_v30 = vld [vmem:[%s730_s13 + $0x6c] sm:$0xf]  ;;  %v611_v39 = vld [vmem:[%s730_s13 + $0x7c] sm:$0xf] }
  0x21   : > { %v217_v25 = vrot.slane %v216_v14, 2  ;;  %v235_v26 = vmax.f32 %v233_v5, %v234_v15  ;;  %v251_v27 = vmax.f32 %v249_v16, %v250_v17  ;;  %v265_v33 = vsel %vm152_vm0, %v606_v18, -inf  ;;  %v612_v40 = vld [vmem:[%s730_s13 + $0x80] sm:$0xf]  ;;  %v613_v45 = vld [vmem:[%s730_s13 + $0x90] sm:$0xf] }
  0x22   : > { %167 = vst.msk [vmem:[%s786_s17 + $0x5] sm:$0x1] %vm166_vm1, %v165_v20  ;;  %v184_v31 = vmax.f32 %v182_v10, %v183_v21  ;;  %v201_v32 = vrot.slane %v200_v22, 1  ;;  %v266_v34 = vsel %vm152_vm0, %v607_v19, -inf  ;;  %v267_v38 = vmax.f32 %v263_v23, %v264_v28  ;;  %v614_v50 = vld [vmem:[%s730_s13 + $0xa0] sm:$0xf] }
  0x23   : > { %v218_v35 = vmax.f32 %v216_v14, %v217_v25  ;;  %v236_v36 = vrot.slane %v235_v26, 2  ;;  %v252_v37 = vrot.slane %v251_v27, 4  ;;  %v268_v42 = vmax.f32 %v265_v33, %v266_v34  ;;  %v615_v51 = vld [vmem:[%s730_s13 + $0xb0] sm:$0xf]  ;;  %v616_v56 = vld [vmem:[%s730_s13 + $0x84] sm:$0xf] }
  0x24   : > { %185 = vst.msk [vmem:[%s786_s17 + $0x6] sm:$0x1] %vm166_vm1, %v184_v31  ;;  %v202_v41 = vmax.f32 %v200_v22, %v201_v32  ;;  %v281_v43 = vsel %vm152_vm0, %v608_v24, -inf  ;;  %v282_v44 = vsel %vm152_vm0, %v609_v29, -inf  ;;  %v283_v49 = vsel %vm152_vm0, %v610_v30, -inf }
  0x25   : > { %v219_v46 = vrot.slane %v218_v35, 1  ;;  %v237_v47 = vmax.f32 %v235_v26, %v236_v36  ;;  %v253_v48 = vmax.f32 %v251_v27, %v252_v37  ;;  %v269_v52 = vmax.f32 %v267_v38, %v268_v42  ;;  %v617_v61 = vld [vmem:[%s730_s13 + $0x94] sm:$0xf]  ;;  %v618_v62 = vld [vmem:[%s730_s13 + $0xa4] sm:$0xf] }
  0x26   : > { %203 = vst.msk [vmem:[%s786_s17 + $0x7] sm:$0x1] %vm166_vm1, %v202_v41  ;;  %v284_v53 = vsel %vm152_vm0, %v611_v39, -inf  ;;  %v285_v54 = vmax.f32 %v281_v43, %v282_v44  ;;  %v300_v55 = vsel %vm152_vm0, %v612_v40, -inf  ;;  %v301_v0 = vsel %vm152_vm0, %v613_v45, -inf }
  0x27   : > { %v220_v57 = vmax.f32 %v218_v35, %v219_v46  ;;  %v238_v58 = vrot.slane %v237_v47, 1  ;;  %v254_v59 = vrot.slane %v253_v48, 2  ;;  %v286_v60 = vmax.f32 %v283_v49, %v284_v53  ;;  %v619_v3 = vld [vmem:[%s730_s13 + $0xb4] sm:$0xf]  ;;  %v628_v8 = vld [vmem:[%s730_s13 + $0xc0] sm:$0xf] }
  0x28   : > { %v270_v63 = vrot.slane %v269_v52, 4  ;;  %v302_v1 = vsel %vm152_vm0, %v614_v50, -inf  ;;  %v303_v2 = vsel %vm152_vm0, %v615_v51, -inf  ;;  %v304_v7 = vmax.f32 %v300_v55, %v301_v0  ;;  %v629_v9 = vld [vmem:[%s730_s13 + $0xd0] sm:$0xf] }
  0x29   : > { %221 = vst.msk [vmem:[%s786_s17 + $0x8] sm:$0x1] %vm166_vm1, %v220_v57  ;;  %v239_v4 = vmax.f32 %v237_v47, %v238_v58  ;;  %v255_v5 = vmax.f32 %v253_v48, %v254_v59  ;;  %v287_v6 = vmax.f32 %v285_v54, %v286_v60  ;;  %v305_v11 = vmax.f32 %v302_v1, %v303_v2  ;;  %v473_v14 = vld [vmem:[%s786_s17 + $0x5] sm:$0x1]  ;;  %v630_v15 = vld [vmem:[%s730_s13 + $0xe0] sm:$0xf] }
  0x2a   : > { %v271_v10 = vmax.f32 %v269_v52, %v270_v63  ;;  %v318_v12 = vsel %vm152_vm0, %v616_v56, -inf  ;;  %v319_v13 = vsel %vm152_vm0, %v617_v61, -inf  ;;  %v631_v19 = vld [vmem:[%s730_s13 + $0xf0] sm:$0xf]  ;;  %v320_v22 = vsel %vm152_vm0, %v618_v62, -inf }
  0x2b   : > { %240 = vst.msk [vmem:[%s786_s17 + $0x9] sm:$0x1] %vm166_vm1, %v239_v4  ;;  %v256_v16 = vrot.slane %v255_v5, 1  ;;  %v288_v17 = vrot.slane %v287_v6, 4  ;;  %v322_v18 = vmax.f32 %v318_v12, %v319_v13  ;;  %v306_v21 = vmax.f32 %v304_v7, %v305_v11  ;;  %v474_v24 = vld [vmem:[%s786_s17 + $0x6] sm:$0x1] }
  0x2c   : > { %v272_v20 = vrot.slane %v271_v10, 2  ;;  %v321_v23 = vsel %vm152_vm0, %v619_v3, -inf  ;;  %v475_v28 = vmax.f32 %v473_v14, %v474_v24  ;;  %v620_v30 = vld [vmem:[%s730_s13 + $0x88] sm:$0xf]  ;;  %v373_v33 = vsel %vm152_vm0, %v628_v8, -inf }
  0x2d   : > { %v257_v25 = vmax.f32 %v255_v5, %v256_v16  ;;  %v289_v26 = vmax.f32 %v287_v6, %v288_v17  ;;  %v323_v27 = vmax.f32 %v320_v22, %v321_v23  ;;  %v835_v29 = vld [vmem:[%s786_s17 + $0x7] sm:$0x1]  ;;  %v307_v32 = vrot.slane %v306_v21, 4  ;;  %v621_v35 = vld [vmem:[%s730_s13 + $0x98] sm:$0xf] }
  0x2e   : > { %v273_v31 = vmax.f32 %v271_v10, %v272_v20  ;;  %v374_v34 = vsel %vm152_vm0, %v629_v9, -inf  ;;  %v375_v38 = vsel %vm152_vm0, %v630_v15, -inf  ;;  %v376_v39 = vsel %vm152_vm0, %v631_v19, -inf  ;;  %v622_v45 = vld [vmem:[%s730_s13 + $0xa8] sm:$0xf] }
  0x2f   : > { %258 = vst.msk [vmem:[%s786_s17 + $0xa] sm:$0x1] %vm166_vm1, %v257_v25  ;;  %v290_v36 = vrot.slane %v289_v26, 2  ;;  %v324_v37 = vmax.f32 %v322_v18, %v323_v27  ;;  %v308_v41 = vmax.f32 %v306_v21, %v307_v32  ;;  %v377_v42 = vmax.f32 %v373_v33, %v374_v34  ;;  %v623_v49 = vld [vmem:[%s730_s13 + $0xb8] sm:$0xf] }
  0x30   : > { %v274_v40 = vrot.slane %v273_v31, 1  ;;  %v378_v43 = vmax.f32 %v375_v38, %v376_v39  ;;  %v846_v44 = vld [vmem:[%s786_s17 + $0x8] sm:$0x1]  ;;  %v336_v50 = vsel %vm152_vm0, %v620_v30, -inf  ;;  %v624_v51 = vld [vmem:[%s730_s13 + $0x8c] sm:$0xf] }
  0x31   : > { %v291_v46 = vmax.f32 %v289_v26, %v290_v36  ;;  %v325_v47 = vrot.slane %v324_v37, 4  ;;  %v483_v48 = vmax.f32 %v835_v29, %v846_v44  ;;  %v309_v53 = vrot.slane %v308_v41, 2  ;;  %v625_v57 = vld [vmem:[%s730_s13 + $0x9c] sm:$0xf]  ;;  %v626_v62 = vld [vmem:[%s730_s13 + $0xac] sm:$0xf] }
  0x32   : > { %v275_v52 = vmax.f32 %v273_v31, %v274_v40  ;;  %v476_v54 = vld [vmem:[%s786_s17 + $0x9] sm:$0x1]  ;;  %v379_v55 = vmax.f32 %v377_v42, %v378_v43  ;;  %v337_v56 = vsel %vm152_vm0, %v621_v35, -inf  ;;  %v338_v61 = vsel %vm152_vm0, %v622_v45, -inf  ;;  %v627_v63 = vld [vmem:[%s730_s13 + $0xbc] sm:$0xf] }
  0x33   : > { %v292_v58 = vrot.slane %v291_v46, 1  ;;  %v326_v59 = vmax.f32 %v324_v37, %v325_v47  ;;  %v477_v60 = vmax.f32 %v475_v28, %v476_v54  ;;  %v310_v0 = vmax.f32 %v308_v41, %v309_v53  ;;  %v632_v4 = vld [vmem:[%s730_s13 + $0xc4] sm:$0xf]  ;;  %v633_v5 = vld [vmem:[%s730_s13 + $0xd4] sm:$0xf] }
  0x34   : > { %276 = vst.msk [vmem:[%s786_s17 + $0xb] sm:$0x1] %vm166_vm1, %v275_v52  ;;  %v380_v1 = vrot.slane %v379_v55, 4  ;;  %v339_v2 = vsel %vm152_vm0, %v623_v49, -inf  ;;  %v340_v3 = vmax.f32 %v336_v50, %v337_v56  ;;  %v354_v9 = vsel %vm152_vm0, %v624_v51, -inf }
  0x35   : > { %v293_v6 = vmax.f32 %v291_v46, %v292_v58  ;;  %v327_v7 = vrot.slane %v326_v59, 2  ;;  %v341_v8 = vmax.f32 %v338_v61, %v339_v2  ;;  %v634_v10 = vld [vmem:[%s730_s13 + $0xe4] sm:$0xf]  ;;  %v635_v11 = vld [vmem:[%s730_s13 + $0xf4] sm:$0xf]  ;;  %v311_v12 = vrot.slane %v310_v0, 1 }
  0x36   : > { %v478_v13 = vld [vmem:[%s786_s17 + $0xa] sm:$0x1]  ;;  %v381_v14 = vmax.f32 %v379_v55, %v380_v1  ;;  %v355_v15 = vsel %vm152_vm0, %v625_v57, -inf  ;;  %v356_v16 = vsel %vm152_vm0, %v626_v62, -inf  ;;  %v357_v20 = vsel %vm152_vm0, %v627_v63, -inf }
  0x37   : > { %294 = vst.msk [vmem:[%s786_s17 + $0xc] sm:$0x1] %vm166_vm1, %v293_v6  ;;  %v328_v17 = vmax.f32 %v326_v59, %v327_v7  ;;  %v479_v18 = vmax.f32 %v477_v60, %v478_v13  ;;  %v342_v19 = vmax.f32 %v340_v3, %v341_v8  ;;  %v636_v21 = vld [vmem:[%s730_s13 + $0xc8] sm:$0xf]  ;;  %v312_v22 = vmax.f32 %v310_v0, %v311_v12  ;;  %v637_v26 = vld [vmem:[%s730_s13 + $0xd8] sm:$0xf] }
  0x38   : > { %v382_v23 = vrot.slane %v381_v14, 2  ;;  %v358_v24 = vmax.f32 %v354_v9, %v355_v15  ;;  %v359_v25 = vmax.f32 %v356_v16, %v357_v20  ;;  %v638_v27 = vld [vmem:[%s730_s13 + $0xe8] sm:$0xf]  ;;  %v391_v31 = vsel %vm152_vm0, %v632_v4, -inf  ;;  %v639_v37 = vld [vmem:[%s730_s13 + $0xf8] sm:$0xf] }
  0x39   : > { %v329_v28 = vrot.slane %v328_v17, 1  ;;  %480 = vst.msk [vmem:[%s786_s17 + $0x1] sm:$0x1] %vm166_vm1, %v479_v18  ;;  %v343_v30 = vrot.slane %v342_v19, 4  ;;  %v392_v32 = vsel %vm152_vm0, %v633_v5, -inf  ;;  %v393_v35 = vsel %vm152_vm0, %v634_v10, -inf }
  0x3a   : > { %313 = vst.msk [vmem:[%s786_s17 + $0xd] sm:$0x1] %vm166_vm1, %v312_v22  ;;  %v383_v33 = vmax.f32 %v381_v14, %v382_v23  ;;  %v360_v34 = vmax.f32 %v358_v24, %v359_v25  ;;  %v394_v36 = vsel %vm152_vm0, %v635_v11, -inf  ;;  %v395_v41 = vmax.f32 %v391_v31, %v392_v32  ;;  %v640_v43 = vld [vmem:[%s730_s13 + $0xcc] sm:$0xf] }
  0x3b   : > { %v330_v38 = vmax.f32 %v328_v17, %v329_v28  ;;  %v484_v39 = vld [vmem:[%s786_s17 + $0xb] sm:$0x1]  ;;  %v344_v40 = vmax.f32 %v342_v19, %v343_v30  ;;  %v396_v42 = vmax.f32 %v393_v35, %v394_v36  ;;  %v641_v45 = vld [vmem:[%s730_s13 + $0xdc] sm:$0xf]  ;;  %v409_v50 = vsel %vm152_vm0, %v636_v21, -inf }
  0x3c   : > { %v384_v46 = vrot.slane %v383_v33, 1  ;;  %v485_v47 = vmax.f32 %v483_v48, %v484_v39  ;;  %v361_v49 = vrot.slane %v360_v34, 4  ;;  %v642_v51 = vld [vmem:[%s730_s13 + $0xec] sm:$0xf]  ;;  %v410_v54 = vsel %vm152_vm0, %v637_v26, -inf }
  0x3d   : > { %331 = vst.msk [vmem:[%s786_s17 + $0xe] sm:$0x1] %vm166_vm1, %v330_v38  ;;  %v345_v52 = vrot.slane %v344_v40, 2  ;;  %v397_v53 = vmax.f32 %v395_v41, %v396_v42  ;;  %v411_v55 = vsel %vm152_vm0, %v638_v27, -inf  ;;  %v412_v44 = vsel %vm152_vm0, %v639_v37, -inf }
  0x3e   : > { %v385_v56 = vmax.f32 %v383_v33, %v384_v46  ;;  %v486_v57 = vld [vmem:[%s786_s17 + $0xc] sm:$0x1]  ;;  %v362_v29 = vmax.f32 %v360_v34, %v361_v49  ;;  %v413_v48 = vmax.f32 %v409_v50, %v410_v54  ;;  %v643_v58 = vld [vmem:[%s730_s13 + $0xfc] sm:$0xf]  ;;  %v441_v59 = vld [vmem:[%s786_s17 + $0x5] sm:$0x1]  ;;  %v414_v0 = vmax.f32 %v411_v55, %v412_v44 }
  0x3f   : > { %v442_v60 = vld [vmem:[%s786_s17 + $0x6] sm:$0x1]  ;;  %v487_v61 = vmax.f32 %v485_v47, %v486_v57  ;;  %v346_v62 = vmax.f32 %v344_v40, %v345_v52  ;;  %v398_v63 = vrot.slane %v397_v53, 4  ;;  %v427_v2 = vsel %vm152_vm0, %v640_v43, -inf  ;;  %v444_v9 = vld [vmem:[%s786_s17 + $0x7] sm:$0x1] }
  0x40   : > { %386 = vst.msk [vmem:[%s786_s17 + $0x11] sm:$0x1] %vm166_vm1, %v385_v56  ;;  %v363_v1 = vrot.slane %v362_v29, 2  ;;  %v428_v3 = vsel %vm152_vm0, %v641_v45, -inf  ;;  %v429_v4 = vsel %vm152_vm0, %v642_v51, -inf  ;;  %v415_v7 = vmax.f32 %v413_v48, %v414_v0 }
  0x41   : > { %488 = vst.msk [vmem:[%s786_s17 + $0x2] sm:$0x1] %vm166_vm1, %v487_v61  ;;  %v347_v5 = vrot.slane %v346_v62, 1  ;;  %v399_v6 = vmax.f32 %v397_v53, %v398_v63  ;;  %v430_v8 = vsel %vm152_vm0, %v643_v58, -inf  ;;  %v431_v11 = vmax.f32 %v427_v2, %v428_v3  ;;  %v446_v17 = vld [vmem:[%s786_s17 + $0x8] sm:$0x1] }
  0x42   : > { %v364_v10 = vmax.f32 %v362_v29, %v363_v1  ;;  %v432_v12 = vmax.f32 %v429_v4, %v430_v8  ;;  %v443_v13 = vmax.f32 %v441_v59, %v442_v60  ;;  %v416_v16 = vrot.slane %v415_v7, 4  ;;  %v448_v23 = vld [vmem:[%s786_s17 + $0x9] sm:$0x1]  ;;  %v450_v30 = vld [vmem:[%s786_s17 + $0xa] sm:$0x1] }
  0x43   : > { %v348_v14 = vmax.f32 %v346_v62, %v347_v5  ;;  %v400_v15 = vrot.slane %v399_v6, 2  ;;  %v489_v32 = vld [vmem:[%s786_s17 + $0xd] sm:$0x1]  ;;  %v452_v37 = vld [vmem:[%s786_s17 + $0xb] sm:$0x1] }
  0x44   : > { %v365_v18 = vrot.slane %v364_v10, 1  ;;  %v433_v19 = vmax.f32 %v431_v11, %v432_v12  ;;  %v445_v20 = vmax.f32 %v443_v13, %v444_v9  ;;  %v417_v22 = vmax.f32 %v415_v7, %v416_v16  ;;  %v490_v33 = vld [vmem:[%s786_s17 + $0xe] sm:$0x1]  ;;  %v454_v42 = vld [vmem:[%s786_s17 + $0xc] sm:$0x1] }
  0x45   : > { %349 = vst.msk [vmem:[%s786_s17 + $0xf] sm:$0x1] %vm166_vm1, %v348_v14  ;;  %v401_v21 = vmax.f32 %v399_v6, %v400_v15  ;;  %v491_v41 = vmax.f32 %v489_v32, %v490_v33  ;;  %v456_v49 = vld [vmem:[%s786_s17 + $0xd] sm:$0x1]  ;;  %v458_v53 = vld [vmem:[%s786_s17 + $0xe] sm:$0x1] }
  0x46   : > { %v366_v24 = vmax.f32 %v364_v10, %v365_v18  ;;  %v434_v25 = vrot.slane %v433_v19, 4  ;;  %v447_v26 = vmax.f32 %v445_v20, %v446_v17  ;;  %v418_v28 = vrot.slane %v417_v22, 2 }
  0x47   : > { %v402_v27 = vrot.slane %v401_v21, 1  ;;  %v492_v45 = vld [vmem:[%s786_s17 + $0x11] sm:$0x1] }
  0x48   : > { %367 = vst.msk [vmem:[%s786_s17 + $0x10] sm:$0x1] %vm166_vm1, %v366_v24  ;;  %v435_v31 = vmax.f32 %v433_v19, %v434_v25  ;;  %v449_v34 = vmax.f32 %v447_v26, %v448_v23  ;;  %v419_v36 = vmax.f32 %v417_v22, %v418_v28  ;;  %v493_v52 = vmax.f32 %v491_v41, %v492_v45  ;;  %v464_v62 = vld [vmem:[%s786_s17 + $0x11] sm:$0x1] }
  0x49   : > { %v403_v35 = vmax.f32 %v401_v21, %v402_v27 }
  0x4a   : > { %v436_v38 = vrot.slane %v435_v31, 2  ;;  %v451_v39 = vmax.f32 %v449_v34, %v450_v30  ;;  %v420_v40 = vrot.slane %v419_v36, 1 }
  0x4b   : > { %404 = vst.msk [vmem:[%s786_s17 + $0x12] sm:$0x1] %vm166_vm1, %v403_v35 }
  0x4c   : > { %v437_v43 = vmax.f32 %v435_v31, %v436_v38  ;;  %v453_v46 = vmax.f32 %v451_v39, %v452_v37  ;;  %v421_v47 = vmax.f32 %v419_v36, %v420_v40  ;;  %v497_v55 = vld [vmem:[%s786_s17 + $0xf] sm:$0x1] }
  0x4d   : > { %v460_v29 = vld [vmem:[%s786_s17 + $0xf] sm:$0x1] }
  0x4e   : > { %v438_v50 = vrot.slane %v437_v43, 1  ;;  %v455_v51 = vmax.f32 %v453_v46, %v454_v42  ;;  %422 = vst.msk [vmem:[%s786_s17 + $0x13] sm:$0x1] %vm166_vm1, %v421_v47 }
  0x4f   : > { %v498_v56 = vld [vmem:[%s786_s17 + $0x10] sm:$0x1] }
  0x50   : > { %v439_v54 = vmax.f32 %v437_v43, %v438_v50  ;;  %v457_v57 = vmax.f32 %v455_v51, %v456_v49  ;;  %v499_v59 = vmax.f32 %v497_v55, %v498_v56  ;;  %v462_v60 = vld [vmem:[%s786_s17 + $0x10] sm:$0x1] }
  0x52   : > { %440 = vst.msk [vmem:[%s786_s17 + $0x14] sm:$0x1] %vm166_vm1, %v439_v54  ;;  %v494_v44 = vld [vmem:[%s786_s17 + $0x12] sm:$0x1]  ;;  %v459_v48 = vmax.f32 %v457_v57, %v458_v53 }
  0x53   : > { %v495_v58 = vmax.f32 %v493_v52, %v494_v44  ;;  %v466_v2 = vld [vmem:[%s786_s17 + $0x12] sm:$0x1] }
  0x54   : > { %v461_v61 = vmax.f32 %v459_v48, %v460_v29 }
  0x55   : > { %496 = vst.msk [vmem:[%s786_s17 + $0x3] sm:$0x1] %vm166_vm1, %v495_v58  ;;  %v500_v63 = vld [vmem:[%s786_s17 + $0x13] sm:$0x1] }
  0x56   : > { %v463_v0 = vmax.f32 %v461_v61, %v462_v60  ;;  %v501_v1 = vmax.f32 %v499_v59, %v500_v63  ;;  %v468_v5 = vld [vmem:[%s786_s17 + $0x13] sm:$0x1] }
  0x58   : > { %v465_v3 = vmax.f32 %v463_v0, %v464_v62 }
  0x59   : > { %v502_v4 = vld [vmem:[%s786_s17 + $0x14] sm:$0x1] }
  0x5a   : > { %v503_v6 = vmax.f32 %v501_v1, %v502_v4  ;;  %v467_v7 = vmax.f32 %v465_v3, %v466_v2  ;;  %v470_v8 = vld [vmem:[%s786_s17 + $0x14] sm:$0x1] }
  0x5c   : > { %504 = vst.msk [vmem:[%s786_s17 + $0x4] sm:$0x1] %vm166_vm1, %v503_v6  ;;  %v469_v9 = vmax.f32 %v467_v7, %v468_v5 }
  0x5e   : > { %v471_v10 = vmax.f32 %v469_v9, %v470_v8 }
  0x60   : > { %472 = vst.msk [vmem:[%s786_s17] sm:$0x1] %vm166_vm1, %v471_v10 }
  0x61 PF: > { %s11_s8 = sadd.s32 1, %s694_s8   ;;  %s960_s6 = smov %s690_s7 }
  0x62   : > { %p8_p5 = scmp.ge.s32.totalorder %s11_s8, 4   ;;  %s961_s7 = smov %s963_s9 }
  0x64   :  { %10 = sbr.rel (!%p8_p5) target bundleno = 2 (0x2), region = 57 }

</bundles_post_ra>
